<compile_context>
chip_gen: v7x
topology: tpu7x:2x2x1
jax: 0.10.0
libtpu: 0.0.40
codegen_flags: <defaults>
</compile_context>

<pallas_src>
import math
import functools

import jax
import jax.numpy as jnp
from jax import lax
from jax.experimental import pallas as pl
from jax.experimental.pallas import tpu as pltpu


# ---------------------------------------------------------------------------
# Fused kernel: primary 1x1 conv + BN + ReLU, then a single combined matmul
# that produces BOTH the x1 passthrough rows and the cheap grouped kxk conv
# rows (+BN +ReLU), written with one full-width store.
# ---------------------------------------------------------------------------
def _ghost_fused_kernel(x_ref, w1_ref, b1_ref, wf_ref, bf_ref, o_ref,
                        *, H, W, dw_size):
    # x_ref : (1, Cin, HW)          input image, channels x flattened HW
    # w1_ref: (Cinit, Cin)          BN-folded primary 1x1 weights
    # b1_ref: (Cinit, 1)            BN-folded primary bias
    # wf_ref: (oup, k*k*Cinit)      combined weights: identity rows selecting
    #                               the centre tap (x1 passthrough) followed
    #                               by BN-folded block-structured cheap rows
    # bf_ref: (oup, 1)              combined bias (0 for passthrough rows)
    # o_ref : (1, oup, HW)          output, channels x flattened HW
    HW = H * W
    k = dw_size
    p = k // 2
    cinit = w1_ref.shape[0]

    # ---- primary 1x1 conv (+BN) + ReLU: (Cinit, Cin) @ (Cin, HW) on MXU ----
    x1 = jnp.dot(w1_ref[...], x_ref[0], preferred_element_type=jnp.float32)
    x1 = jnp.maximum(x1 + b1_ref[...], 0.0)                  # (Cinit, HW)

    # ---- build the k*k shifted tap planes of x1 (vectorized grouped conv) --
    # Zero-pad along the flattened HW axis so vertical (dy) out-of-range taps
    # read zeros automatically.
    pad = p * W + p
    zpad = jnp.zeros((cinit, pad), jnp.float32)
    xpad = jnp.concatenate([zpad, x1, zpad], axis=1)         # (Cinit, HW+2pad)

    # Column masks for horizontal (dx) out-of-range taps (hoisted out of the
    # tap loop; one (1, HW) mask per nonzero dx).  They also kill the
    # incidental vertical wrap-around that a combined dy/dx shift can cause.
    col = lax.broadcasted_iota(jnp.int32, (1, HW), 1) % W
    masks = {}
    for dx in range(-p, p + 1):
        if dx < 0:
            masks[dx] = col >= -dx
        elif dx > 0:
            masks[dx] = col < W - dx

    planes = []
    for ky in range(k):
        for kx in range(k):
            off = ky * W + kx                                # static offset
            tap = xpad[:, off:off + HW]                      # (Cinit, HW)
            dx = kx - p
            if dx != 0:
                tap = jnp.where(masks[dx], tap, 0.0)
            planes.append(tap)
    S = jnp.concatenate(planes, axis=0)                      # (k*k*Cinit, HW)

    # ---- combined matmul: x1 passthrough rows + cheap conv rows, +bias,
    #      +ReLU (exact for passthrough rows since x1 >= 0), single store ----
    out = jnp.dot(wf_ref[...], S, preferred_element_type=jnp.float32)
    out = jnp.maximum(out + bf_ref[...], 0.0)                # (oup, HW)
    o_ref[0] = out


# ---------------------------------------------------------------------------
# Parameter init (deterministic, synthetic) — mirrors GhostModule.__init__.
# ---------------------------------------------------------------------------
def ghost_module_init(key, inp, oup, kernel_size=1, ratio=7, dw_size=3):
    assert kernel_size == 1, "only the default kernel_size=1 is implemented"
    init_channels = math.ceil(oup / ratio)
    new_channels = init_channels * (ratio - 1)
    k1, k2 = jax.random.split(key)
    w1 = 0.1 * jax.random.normal(
        k1, (init_channels, inp, kernel_size, kernel_size), jnp.float32)
    w2 = 0.1 * jax.random.normal(
        k2, (new_channels, 1, dw_size, dw_size), jnp.float32)
    # BatchNorm (eval-mode) parameters: deterministic and non-trivial.
    g1 = 1.0 + 0.10 * jnp.arange(init_channels, dtype=jnp.float32)
    b1 = 0.05 * jnp.arange(init_channels, dtype=jnp.float32)
    m1 = 0.01 * jnp.arange(init_channels, dtype=jnp.float32)
    v1 = 1.0 + 0.02 * jnp.arange(init_channels, dtype=jnp.float32)
    g2 = 1.0 + 0.05 * jnp.arange(new_channels, dtype=jnp.float32)
    b2 = -0.02 * jnp.arange(new_channels, dtype=jnp.float32)
    m2 = 0.015 * jnp.arange(new_channels, dtype=jnp.float32)
    v2 = 1.0 + 0.03 * jnp.arange(new_channels, dtype=jnp.float32)
    return dict(w1=w1, w2=w2, bn1=(g1, b1, m1, v1), bn2=(g2, b2, m2, v2))


# ---------------------------------------------------------------------------
# Forward pass (Pallas). x is NCHW, same as the PyTorch module.
# ---------------------------------------------------------------------------
def ghost_module_forward(params, x, *, oup, ratio=7, dw_size=3, eps=1e-5):
    N, Cin, H, W = x.shape
    HW = H * W
    k = dw_size
    kk = k * k

    # Fold eval-mode BN into the primary conv.
    w1 = params["w1"][:, :, 0, 0]                       # (Cinit, Cin)
    g1, b1, m1, v1 = params["bn1"]
    s1 = g1 / jnp.sqrt(v1 + eps)
    w1f = w1 * s1[:, None]                              # (Cinit, Cin)
    bias1 = (b1 - m1 * s1)[:, None]                     # (Cinit, 1)
    cinit = w1.shape[0]

    # Fold eval-mode BN into the cheap conv; keep only the channels that
    # survive out[:, :oup] (the concat+slice by omission).
    g2, b2, m2, v2 = params["bn2"]
    s2 = g2 / jnp.sqrt(v2 + eps)
    n_extra = oup - cinit
    assert n_extra >= 1, "need at least one cheap-conv output channel"
    rm1 = ratio - 1
    w2f = (params["w2"][:, 0] * s2[:, None, None])[:n_extra]   # (n_extra,k,k)
    w2f = w2f.reshape(n_extra, kk)
    bias2 = (b2 - m2 * s2)[:n_extra]                           # (n_extra,)

    # Combined weight matrix (oup, k*k*Cinit), column layout tap-major /
    # channel-minor to match S built in the kernel:
    #  * rows 0..Cinit-1: identity selection of the centre tap -> pure x1
    #    passthrough (bias 0; ReLU is a no-op since x1 >= 0).
    #  * rows Cinit..oup-1: block-structured cheap conv — output channel co
    #    only reads input channel g = co // (ratio-1).
    center = (k // 2) * k + (k // 2)
    wfull = jnp.zeros((oup, kk * cinit), jnp.float32)
    wfull = wfull.at[jnp.arange(cinit),
                     center * cinit + jnp.arange(cinit)].set(1.0)
    co = jnp.arange(n_extra)
    g_of_co = co // rm1
    for t in range(kk):
        wfull = wfull.at[cinit + co, t * cinit + g_of_co].set(w2f[:, t])
    bfull = jnp.concatenate(
        [jnp.zeros((cinit,), jnp.float32), bias2])[:, None]    # (oup, 1)

    x_flat = x.reshape(N, Cin, HW)                      # no transpose needed

    kernel = functools.partial(_ghost_fused_kernel, H=H, W=W, dw_size=k)
    out_flat = pl.pallas_call(
        kernel,
        out_shape=jax.ShapeDtypeStruct((N, oup, HW), jnp.float32),
        grid=(N,),
        in_specs=[
            pl.BlockSpec((1, Cin, HW), lambda n: (n, 0, 0)),
            pl.BlockSpec((cinit, Cin), lambda n: (0, 0)),
            pl.BlockSpec((cinit, 1), lambda n: (0, 0)),
            pl.BlockSpec((oup, kk * cinit), lambda n: (0, 0)),
            pl.BlockSpec((oup, 1), lambda n: (0, 0)),
        ],
        out_specs=pl.BlockSpec((1, oup, HW), lambda n: (n, 0, 0)),
        compiler_params=pltpu.CompilerParams(
            dimension_semantics=("parallel",)),
    )(x_flat, w1f, bias1, wfull, bfull)
    return out_flat.reshape(N, oup, H, W)


# ---------------------------------------------------------------------------
# Pure-JAX reference (eval-mode BN), for correctness checking.
# ---------------------------------------------------------------------------
def ghost_module_reference(params, x, *, oup, ratio=7, dw_size=3, eps=1e-5):
    g1, b1, m1, v1 = params["bn1"]
    g2, b2, m2, v2 = params["bn2"]

    def bn(y, g, b, m, v):
        return (y - m[None, :, None, None]) / jnp.sqrt(
            v[None, :, None, None] + eps) * g[None, :, None, None] + \
            b[None, :, None, None]

    x1 = lax.conv_general_dilated(
        x, params["w1"], (1, 1), "VALID",
        dimension_numbers=("NCHW", "OIHW", "NCHW"))
    x1 = jnp.maximum(bn(x1, g1, b1, m1, v1), 0.0)
    cinit = x1.shape[1]
    p = dw_size // 2
    x2 = lax.conv_general_dilated(
        x1, params["w2"], (1, 1), [(p, p), (p, p)],
        dimension_numbers=("NCHW", "OIHW", "NCHW"),
        feature_group_count=cinit)
    x2 = jnp.maximum(bn(x2, g2, b2, m2, v2), 0.0)
    out = jnp.concatenate([x1, x2], axis=1)
    return out[:, :oup, :, :]


if __name__ == "__main__":
    key = jax.random.PRNGKey(0)
    kx, kp = jax.random.split(key)

    N, Cin, H, W = 2, 4, 16, 16
    oup, ratio, dw = 13, 7, 3   # init_channels = ceil(13/7) = 2, new = 12

    x = jax.random.normal(kx, (N, Cin, H, W), jnp.float32)
    params = ghost_module_init(kp, Cin, oup, ratio=ratio, dw_size=dw)

    out = ghost_module_forward(params, x, oup=oup, ratio=ratio, dw_size=dw)
    out = jax.block_until_ready(out)

    ref = ghost_module_reference(params, x, oup=oup, ratio=ratio, dw_size=dw)
    assert out.shape == (N, oup, H, W), out.shape
    assert jnp.allclose(out, ref, atol=1e-4, rtol=1e-4), \
        float(jnp.max(jnp.abs(out - ref)))

    print("KERNEL_OK")
</pallas_src>

<mosaic_0001>
module attributes {stable_mosaic.version = 11 : i64} {
  func.func @_ghost_fused_kernel(%arg0: i32, %arg1: memref<1x4x256xf32, #tpu.memory_space<vmem>>, %arg2: memref<2x4xf32, #tpu.memory_space<vmem>>, %arg3: memref<2x1xf32, #tpu.memory_space<vmem>>, %arg4: memref<13x18xf32, #tpu.memory_space<vmem>>, %arg5: memref<13x1xf32, #tpu.memory_space<vmem>>, %arg6: memref<1x13x256xf32, #tpu.memory_space<vmem>>) attributes {dimension_semantics = [#tpu.dimension_semantics<parallel>], iteration_bounds = array<i64: 2>, scalar_prefetch = 0 : i64, scratch_operands = 0 : i64, tpu.core_type = #tpu.core_type<tc>, window_params = [{transform_indices = @transform_0, window_bounds = array<i64: 1, 4, 256>}, {pipeline_mode = #tpu.pipeline_mode<synchronous>, transform_indices = @transform_1, window_bounds = array<i64: 2, 4>}, {pipeline_mode = #tpu.pipeline_mode<synchronous>, transform_indices = @transform_2, window_bounds = array<i64: 2, 1>}, {pipeline_mode = #tpu.pipeline_mode<synchronous>, transform_indices = @transform_3, window_bounds = array<i64: 13, 18>}, {pipeline_mode = #tpu.pipeline_mode<synchronous>, transform_indices = @transform_4, window_bounds = array<i64: 13, 1>}, {transform_indices = @transform_5, window_bounds = array<i64: 1, 13, 256>}]} {
    %c0 = arith.constant 0 : index
    %c0_0 = arith.constant 0 : index
    %0 = vector.load %arg2[%c0, %c0_0] : memref<2x4xf32, #tpu.memory_space<vmem>>, vector<2x4xf32>
    %c0_1 = arith.constant 0 : index
    %c0_2 = arith.constant 0 : index
    %c0_3 = arith.constant 0 : index
    %1 = vector.load %arg1[%c0_1, %c0_2, %c0_3] : memref<1x4x256xf32, #tpu.memory_space<vmem>>, vector<1x4x256xf32>
    %2 = vector.shape_cast %1 : vector<1x4x256xf32> to vector<4x256xf32>
    %cst = arith.constant dense<0.000000e+00> : vector<2x256xf32>
    %3 = tpu.matmul %0, %2, %cst {dimension_numbers = #tpu.dot_dimension_numbers<[1], [0], [0], [1], [0, 0, 1, 1], [], []>} : vector<2x4xf32>, vector<4x256xf32>, vector<2x256xf32> -> vector<2x256xf32>
    %c0_4 = arith.constant 0 : index
    %c0_5 = arith.constant 0 : index
    %4 = vector.load %arg3[%c0_4, %c0_5] : memref<2x1xf32, #tpu.memory_space<vmem>>, vector<2x1xf32>
    %5 = vector.broadcast %4 : vector<2x1xf32> to vector<2x256xf32>
    %6 = arith.addf %3, %5 : vector<2x256xf32>
    %cst_6 = arith.constant 0.000000e+00 : f32
    %7 = vector.broadcast %cst_6 : f32 to vector<2x256xf32>
    %8 = arith.maximumf %6, %7 : vector<2x256xf32>
    %cst_7 = arith.constant 0.000000e+00 : f32
    %9 = vector.broadcast %cst_7 : f32 to vector<2x17xf32>
    %10 = tpu.concatenate %9, %8, %9 in 1 : vector<2x17xf32>, vector<2x256xf32>, vector<2x17xf32> -> vector<2x290xf32>
    %11 = tpu.iota {dimensions = array<i32: 1>} : vector<1x256xi32>
    %c16_i32 = arith.constant 16 : i32
    %c0_i32 = arith.constant 0 : i32
    %12 = arith.cmpi eq, %c16_i32, %c0_i32 : i32
    %c1_i32 = arith.constant 1 : i32
    %13 = arith.select %12, %c1_i32, %c16_i32 : i32
    %14 = vector.broadcast %13 : i32 to vector<1x256xi32>
    %15 = arith.remsi %11, %14 : vector<1x256xi32>
    %c0_i32_8 = arith.constant 0 : i32
    %16 = vector.broadcast %c0_i32_8 : i32 to vector<1x256xi32>
    %17 = arith.cmpi ne, %15, %16 : vector<1x256xi32>
    %c0_i32_9 = arith.constant 0 : i32
    %18 = vector.broadcast %c0_i32_9 : i32 to vector<1x256xi32>
    %19 = arith.cmpi slt, %15, %18 : vector<1x256xi32>
    %c0_i32_10 = arith.constant 0 : i32
    %20 = arith.cmpi slt, %13, %c0_i32_10 : i32
    %21 = vector.broadcast %20 : i1 to vector<1x256xi1>
    %22 = vector.broadcast %21 : vector<1x256xi1> to vector<1x256xi1>
    %23 = arith.xori %19, %22 : vector<1x256xi1>
    %24 = arith.andi %23, %17 : vector<1x256xi1>
    %25 = vector.broadcast %13 : i32 to vector<1x256xi32>
    %26 = arith.addi %15, %25 : vector<1x256xi32>
    %27 = arith.select %24, %26, %15 : vector<1x256xi1>, vector<1x256xi32>
    %c1_i32_11 = arith.constant 1 : i32
    %28 = vector.broadcast %c1_i32_11 : i32 to vector<1x256xi32>
    %29 = arith.cmpi sge, %27, %28 : vector<1x256xi32>
    %c15_i32 = arith.constant 15 : i32
    %30 = vector.broadcast %c15_i32 : i32 to vector<1x256xi32>
    %31 = arith.cmpi slt, %27, %30 : vector<1x256xi32>
    %32 = vector.extract_strided_slice %10 {offsets = [0, 0], sizes = [2, 256], strides = [1, 1]} : vector<2x290xf32> to vector<2x256xf32>
    %cst_12 = arith.constant 0.000000e+00 : f32
    %33 = vector.shape_cast %29 : vector<1x256xi1> to vector<1x256xi1>
    %34 = vector.broadcast %33 : vector<1x256xi1> to vector<2x256xi1>
    %35 = vector.broadcast %cst_12 : f32 to vector<2x256xf32>
    %36 = arith.select %34, %32, %35 : vector<2x256xi1>, vector<2x256xf32>
    %37 = vector.extract_strided_slice %10 {offsets = [0, 1], sizes = [2, 256], strides = [1, 1]} : vector<2x290xf32> to vector<2x256xf32>
    %38 = vector.extract_strided_slice %10 {offsets = [0, 2], sizes = [2, 256], strides = [1, 1]} : vector<2x290xf32> to vector<2x256xf32>
    %cst_13 = arith.constant 0.000000e+00 : f32
    %39 = vector.shape_cast %31 : vector<1x256xi1> to vector<1x256xi1>
    %40 = vector.broadcast %39 : vector<1x256xi1> to vector<2x256xi1>
    %41 = vector.broadcast %cst_13 : f32 to vector<2x256xf32>
    %42 = arith.select %40, %38, %41 : vector<2x256xi1>, vector<2x256xf32>
    %43 = vector.extract_strided_slice %10 {offsets = [0, 16], sizes = [2, 256], strides = [1, 1]} : vector<2x290xf32> to vector<2x256xf32>
    %cst_14 = arith.constant 0.000000e+00 : f32
    %44 = vector.shape_cast %29 : vector<1x256xi1> to vector<1x256xi1>
    %45 = vector.broadcast %44 : vector<1x256xi1> to vector<2x256xi1>
    %46 = vector.broadcast %cst_14 : f32 to vector<2x256xf32>
    %47 = arith.select %45, %43, %46 : vector<2x256xi1>, vector<2x256xf32>
    %48 = vector.extract_strided_slice %10 {offsets = [0, 17], sizes = [2, 256], strides = [1, 1]} : vector<2x290xf32> to vector<2x256xf32>
    %49 = vector.extract_strided_slice %10 {offsets = [0, 18], sizes = [2, 256], strides = [1, 1]} : vector<2x290xf32> to vector<2x256xf32>
    %cst_15 = arith.constant 0.000000e+00 : f32
    %50 = vector.shape_cast %31 : vector<1x256xi1> to vector<1x256xi1>
    %51 = vector.broadcast %50 : vector<1x256xi1> to vector<2x256xi1>
    %52 = vector.broadcast %cst_15 : f32 to vector<2x256xf32>
    %53 = arith.select %51, %49, %52 : vector<2x256xi1>, vector<2x256xf32>
    %54 = vector.extract_strided_slice %10 {offsets = [0, 32], sizes = [2, 256], strides = [1, 1]} : vector<2x290xf32> to vector<2x256xf32>
    %cst_16 = arith.constant 0.000000e+00 : f32
    %55 = vector.shape_cast %29 : vector<1x256xi1> to vector<1x256xi1>
    %56 = vector.broadcast %55 : vector<1x256xi1> to vector<2x256xi1>
    %57 = vector.broadcast %cst_16 : f32 to vector<2x256xf32>
    %58 = arith.select %56, %54, %57 : vector<2x256xi1>, vector<2x256xf32>
    %59 = vector.extract_strided_slice %10 {offsets = [0, 33], sizes = [2, 256], strides = [1, 1]} : vector<2x290xf32> to vector<2x256xf32>
    %60 = vector.extract_strided_slice %10 {offsets = [0, 34], sizes = [2, 256], strides = [1, 1]} : vector<2x290xf32> to vector<2x256xf32>
    %cst_17 = arith.constant 0.000000e+00 : f32
    %61 = vector.shape_cast %31 : vector<1x256xi1> to vector<1x256xi1>
    %62 = vector.broadcast %61 : vector<1x256xi1> to vector<2x256xi1>
    %63 = vector.broadcast %cst_17 : f32 to vector<2x256xf32>
    %64 = arith.select %62, %60, %63 : vector<2x256xi1>, vector<2x256xf32>
    %65 = tpu.concatenate %36, %37, %42, %47, %48, %53, %58, %59, %64 in 0 : vector<2x256xf32>, vector<2x256xf32>, vector<2x256xf32>, vector<2x256xf32>, vector<2x256xf32>, vector<2x256xf32>, vector<2x256xf32>, vector<2x256xf32>, vector<2x256xf32> -> vector<18x256xf32>
    %c0_18 = arith.constant 0 : index
    %c0_19 = arith.constant 0 : index
    %66 = vector.load %arg4[%c0_18, %c0_19] : memref<13x18xf32, #tpu.memory_space<vmem>>, vector<13x18xf32>
    %cst_20 = arith.constant dense<0.000000e+00> : vector<13x256xf32>
    %67 = tpu.matmul %66, %65, %cst_20 {dimension_numbers = #tpu.dot_dimension_numbers<[1], [0], [0], [1], [0, 0, 1, 1], [], []>} : vector<13x18xf32>, vector<18x256xf32>, vector<13x256xf32> -> vector<13x256xf32>
    %c0_21 = arith.constant 0 : index
    %c0_22 = arith.constant 0 : index
    %68 = vector.load %arg5[%c0_21, %c0_22] : memref<13x1xf32, #tpu.memory_space<vmem>>, vector<13x1xf32>
    %69 = vector.broadcast %68 : vector<13x1xf32> to vector<13x256xf32>
    %70 = arith.addf %67, %69 : vector<13x256xf32>
    %cst_23 = arith.constant 0.000000e+00 : f32
    %71 = vector.broadcast %cst_23 : f32 to vector<13x256xf32>
    %72 = arith.maximumf %70, %71 : vector<13x256xf32>
    %c0_24 = arith.constant 0 : index
    %c0_25 = arith.constant 0 : index
    %c0_26 = arith.constant 0 : index
    %73 = vector.load %arg6[%c0_24, %c0_25, %c0_26] : memref<1x13x256xf32, #tpu.memory_space<vmem>>, vector<1x13x256xf32>
    %74 = vector.shape_cast %73 : vector<1x13x256xf32> to vector<13x256xf32>
    %75 = vector.shape_cast %72 : vector<13x256xf32> to vector<1x13x256xf32>
    tpu.vector_store %arg6[%c0_24, %c0_25, %c0_26], %75 {strides = array<i32>} : memref<1x13x256xf32, #tpu.memory_space<vmem>>, vector<1x13x256xf32>,
    return
  }
  func.func @transform_0(%arg0: i32) -> (i32, i32, i32) {
    %c0_i32 = arith.constant 0 : i32
    %c0_i32_0 = arith.constant 0 : i32
    %c0_i32_1 = arith.constant 0 : i32
    return %arg0, %c0_i32, %c0_i32_0 : i32, i32, i32
  }
  func.func @transform_1(%arg0: i32) -> (i32, i32) {
    %c0_i32 = arith.constant 0 : i32
    %c0_i32_0 = arith.constant 0 : i32
    %c0_i32_1 = arith.constant 0 : i32
    return %c0_i32, %c0_i32_0 : i32, i32
  }
  func.func @transform_2(%arg0: i32) -> (i32, i32) {
    %c0_i32 = arith.constant 0 : i32
    %c0_i32_0 = arith.constant 0 : i32
    %c0_i32_1 = arith.constant 0 : i32
    return %c0_i32, %c0_i32_0 : i32, i32
  }
  func.func @transform_3(%arg0: i32) -> (i32, i32) {
    %c0_i32 = arith.constant 0 : i32
    %c0_i32_0 = arith.constant 0 : i32
    %c0_i32_1 = arith.constant 0 : i32
    return %c0_i32, %c0_i32_0 : i32, i32
  }
  func.func @transform_4(%arg0: i32) -> (i32, i32) {
    %c0_i32 = arith.constant 0 : i32
    %c0_i32_0 = arith.constant 0 : i32
    %c0_i32_1 = arith.constant 0 : i32
    return %c0_i32, %c0_i32_0 : i32, i32
  }
  func.func @transform_5(%arg0: i32) -> (i32, i32, i32) {
    %c0_i32 = arith.constant 0 : i32
    %c0_i32_0 = arith.constant 0 : i32
    %c0_i32_1 = arith.constant 0 : i32
    return %arg0, %c0_i32, %c0_i32_0 : i32, i32, i32
  }
}

</mosaic_0001>

<bundles_post_ra>
// kernel: tpu_custom_call.1
= control target key start
LH: loop header
LB: loop body
LE: loop exit
PB: predicated region body
PF: predicated region fallthrough
CT: control target
= control target key end

     0   :  { %10 = vsyncpa [#allocation3], 0  ;;  %s887_s18 = smov 0   ;;  %s1050_s0 = inlined_call_operand.vmem [shape: f32[2,4,256], index: 0, kind: input, shape index: {}]   ;;  %s1051_s1 = inlined_call_operand.hbm [shape: f32[2,4], index: 1, kind: input, shape index: {}]   ;;  %s1052_s2 = inlined_call_operand.vmem [shape: f32[2,1], index: 2, kind: input, shape index: {}]   ;;  %s1053_s3 = inlined_call_operand.vmem [shape: f32[13,18], index: 3, kind: input, shape index: {}]   ;;  %s1054_s4 = inlined_call_operand.vmem [shape: f32[13,1], index: 4, kind: input, shape index: {}]   ;;  %s1055_s5 = inlined_call_operand.vmem [shape: f32[2,13,256], index: 5, kind: output, shape index: {}]  }
   0x1 LB: > { %s893_s19 = sadd.s32 4294967295, %s843_s18   ;;  %p709_p0 = scmp.ge.s32.totalorder %s843_s18, 1  ;;  %s843_s18 = sphi %s887_s18, %s16_s18  }
   0x2   : > { %p157_p1 = scmp.lt.s32.totalorder %s843_s18, 3  ;;  %p1056_p3 = scmp.eq.s32.totalorder %s893_s19, 0 }
   0x3   : > { %s845_s21 = smov [#allocation2]   ;;  %s805_s26 = scalar_lea.hbm %s1051_s1, 32 }
   0x4   : > { %p897_p2 = pnand %p709_p0, %p157_p1  ;;  %s170_s22 = sshll.u32 %s845_s21, 4  ;;  %s171_s22 = int_to_ptr.vmem [resolvable:$true] %s170_s22 }
   0x5   : > { %p806_p6 = scmp.ne.s32.totalorder %s1051_s1, %s805_s26  ;;  %p812_p10 = scmp.lt.u32.totalorder %s805_s26, %s1051_s1 }
   0x6   : > { %s1058_s20 = scalar_select %p897_p2, 1, 0 }
   0x7   : > { %p741_p4 = pneg %p897_p2 }
   0x9   : > { %p906_p5 = pnand %p1056_p3, %p741_p4 }
   0xb   : > { %p807_p7 = pneg %p906_p5 }
   0xd   : > { %p808_p8 = pnand %p807_p7, %p806_p6 }
   0xf   : > { %p809_p9 = pneg %p808_p8 }
  0x11   : > { %p814_p11 = pnand %p812_p10, %p809_p9 }
  0x13   : > { %817 = shalt.err (!%p814_p11)
}
  0x14   : > { %s818_s6 = scalar_lea.vmem %s171_s22, 32  ;;  %p826_p1 = scmp.lt.s32.totalorder %s171_s22, %s171_s22 }
  0x15   : > { %p819_p12 = scmp.ne.s32.totalorder %s171_s22, %s818_s6  ;;  %p827_p4 = scmp.lt.s32.totalorder %s818_s6, %s818_s6 }
  0x17   : > { %p821_p13 = pnand %p819_p12, %p807_p7  ;;  %p828_p3 = por %p827_p4, %p826_p1 }
  0x19   : > { %p822_p0 = pneg %p821_p13 }
  0x1b   : > { %p829_p2 = pnand %p828_p3, %p822_p0 }
  0x1d   : > { %832 = shalt.err (!%p829_p2)
}
  0x1e   : > { %744 = dma.hbm_to_vmem [thread:$0]  (!%p906_p5), %s1051_s1, 32, %s171_s22, [#allocation3]  }
  0x1f   : > { %p1060_p6 = scmp.ne.s32.totalorder %s1058_s20, 0 }
  0x20   : > { %p1061_p8 = scmp.eq.s32.totalorder (!%p1060_p6), %s893_s19, 0 }
  0x21   : > { %200 = sbr.rel (%p1060_p6) target bundleno = 752 (0x2f0), region = 40 }
  0x28   : > { %838 = dma.done.wait (%p1061_p8), [#allocation3], 32   ;;  %p1062_p7 = pmov %p1061_p8 }
  0x29   : > { %p228_p9 = scmp.lt.s32.totalorder %s893_s19, 1  ;;  %v846_v0 = vmov 0.0   ;;  %v847_v1 = vmov 0   ;;  %vm252_vm0 = vcmask 1043456   ;;  %v240_v3 = vld [vmem:[%s1052_s2] sm:$0x3]  ;;  %v343_v29 = vlaneseq }
  0x2a   : > { %840 = vsyncadd (%p1062_p7), [#allocation3], 4294967264  ;;  %321 = vmatprep.mubr.f32.mxu0 %v846_v0  ;;  %625 = vmatprep.mubr.f32.mxu1 %v846_v0  ;;  %v238_v5 = vld [vmem:[#allocation2] sm:$0x3]  ;;  %vm248_vm1 = vcmask 31744   ;;  %s848_s15 = smov 17  }
  0x2b   : > { %s1072_s19 = smov (!%p228_p9, %s893_s19), 1  ;;  %767 = vset.pattern.permute.xlu0 %v847_v1  ;;  %803 = vset.pattern.permute.xlu1 %v847_v1  ;;  %vm336_vm2 = vcmask 138240   ;;  %s849_s16 = smov 112   ;;  %v530_v27 = vld [vmem:[%s1054_s4] sm:$0xff]  ;;  %v531_v28 = vld [vmem:[%s1054_s4 + $0x8] sm:$0x1f] }
  0x2c   : > { %s727_s9 = sshll.u32 %s1072_s19, 3  ;;  %243 = vperm.xlu0 %767, %v240_v3   ;;  %s850_s17 = smov 110   ;;  %v344_v30 = vand.u32 127, %v343_v29  ;;  %vm392_vm3 = vcmask 1031168   ;;  %vm431_vm4 = vcmask 785408   ;;  %vm418_vm8 = vcmask 900096  }
  0x2d   : > { %s232_s12 = scalar_lea.vmem %s1050_s0, %s727_s9  ;;  %s851_s20 = smov 111   ;;  %vm405_vm10 = vcmask 916480   ;;  %vm483_vm11 = vcmask 908288   ;;  %vm460_vm12 = vcmask 1039360   ;;  %vm509_vm13 = vcmask 777216  }
  0x2e   : > { %v239_v2 = vld [vmem:[%s232_s12] sm:$0xff]  ;;  %s852_s21 = smov 126   ;;  %s853_s22 = smov 96   ;;  %v345_v33 = vadd.s32 128, %v344_v30  ;;  %v350_v37 = vand.u32 15, %v344_v30  ;;  %vm514_vm14 = vcmask 1041408  }
  0x2f   : > { %v247_v4 = vcombine.high %v239_v2, %v239_v2  ;;  %s854_s23 = smov 127   ;;  %s855_s24 = smov 95   ;;  %vm519_vm15 = vcmask 1045504   ;;  %v529_v43 = vld [vmem:[%s1053_s3 + $0x8] sm:$0x1f] }
  0x30   : > { %s856_s25 = smov 94   ;;  %v357_v36 = vand.u32 15, %v345_v33  ;;  %vm975_vm7 = vcmp.ge.s32.totalorder %v350_v37, 1  ;;  %vm979_vm9 = vcmp.lt.s32.totalorder %v350_v37, 15  ;;  %s728_s9 = sshll.u32 %s1072_s19, 5 }
  0x31   : > { %718 = vmatprep.subr.msk.mxu0 %vm252_vm0, %v247_v4  ;;  %s237_s12 = scalar_lea.vmem %s1055_s5, %s728_s9 }
  0x32   : > { %719 = vmatpush1.msk.msra.mxu0 %vm252_vm0, %v239_v2  ;;  %vm967_vm5 = vcmp.ge.s32.totalorder %v357_v36, 1  ;;  %vm971_vm6 = vcmp.lt.s32.totalorder %v357_v36, 15 }
  0x33   : > { %720 = vmatmul.mubr.msk.f32.vlgmr.msra.gmra.mrb[0].mxu0 %vm248_vm1, %v238_v5  ;;  %vm444_vm1 = vcmask 769024  }
  0x34   : > { %619 = vmatprep.mubr.f32.mxu0 %v846_v0 }
  0xab   : > { %v244_v6 = vpop.permute.xlu0 %243 }
 0x106   : > { %v323_v7 = vpop.f32.mrb[0].mxu0 }
 0x107   : > { %v324_v8 = vadd.f32 %v323_v7, %v244_v6  ;;  %v325_v9 = vpop.f32.mrb[1].mxu0 }
 0x108   : > { %v326_v10 = vadd.f32 %v325_v9, %v244_v6 }
 0x109   : > { %v328_v11 = vmax.f32 %v324_v8, 0.0 }
 0x10a   : > { %v329_v12 = vmax.f32 %v326_v10, 0.0 }
 0x10b   : > { %332 = vrot.lane.b32.xlu0 %v328_v11, %s848_s15 }
 0x10c   : > { %334 = vrot.lane.b32.xlu1 %v329_v12, %s848_s15 }
 0x17d   : > { %v333_v13 = vpop.permute.xlu0 %332 }
 0x17e   : > { %v945_v14 = vsel %vm336_vm2, 0.0, %v333_v13  ;;  %v335_v15 = vpop.permute.xlu1 %334 }
 0x17f   : > { %399 = vrot.lane.b32.xlu0 %v945_v14, %s849_s16  ;;  %412 = vrot.lane.b32.xlu1 %v945_v14, %s850_s17  ;;  %v949_v16 = vsel %vm336_vm2, %v333_v13, %v335_v15  ;;  %v342_v17 = vsel %vm336_vm2, %v335_v15, 0.0  ;;  %v451_v19 = vrot.slane %v945_v14, 6  ;;  %v500_v25 = vrot.slane %v945_v14, 2 }
 0x180   : > { %v773_v18 = vpack.i.bf16 %v342_v17, %v949_v16  ;;  %v452_v20 = vrot.slane %v949_v16, 6  ;;  %v453_v21 = vrot.slane %v342_v17, 6  ;;  %v501_v23 = vrot.slane %v949_v16, 2 }
 0x181   : > { %v502_v24 = vrot.slane %v342_v17, 2  ;;  %v379_v55 = vsel %vm967_vm5, %v949_v16, 0.0  ;;  %v378_v56 = vsel %vm975_vm7, %v945_v14, 0.0 }
 0x182   : > { %v793_v22 = vpack.i.bf16 %v453_v21, %v452_v20 }
 0x183   : > { %477 = vrot.lane.b32.xlu0 %v945_v14, %s851_s20  ;;  %386 = vrot.lane.b32.xlu1 %v945_v14, %s852_s21  ;;  %v798_v26 = vpack.i.bf16 %v502_v24, %v501_v23 }
 0x187   : > { %425 = vrot.lane.b32.xlu1 %v945_v14, %s853_s22  ;;  %774 = vrot.lane.b32.xlu0 %v773_v18, %s852_s21 }
 0x18b   : > { %779 = vrot.lane.b32.xlu0 %v773_v18, %s853_s22  ;;  %769 = vrot.lane.b32.xlu1 %v773_v18, %s850_s17 }
 0x18f   : > { %784 = vrot.lane.b32.xlu0 %v773_v18, %s849_s16  ;;  %454 = vrot.lane.b32.xlu1 %v451_v19, %s854_s23 }
 0x193   : > { %789 = vrot.lane.b32.xlu0 %v773_v18, %s851_s20  ;;  %794 = vrot.lane.b32.xlu1 %v793_v22, %s854_s23 }
 0x197   : > { %503 = vrot.lane.b32.xlu0 %v500_v25, %s855_s24  ;;  %799 = vrot.lane.b32.xlu1 %v798_v26, %s855_s24 }
 0x19b   : > { %442 = vrot.lane.b32.xlu0 %v342_v17, %s856_s25  ;;  %440 = vrot.lane.b32.xlu1 %v949_v16, %s856_s25 }
 0x19f   : > { %534 = vperm.xlu0 %767, %v530_v27   ;;  %438 = vrot.lane.b32.xlu1 %v945_v14, %s856_s25 }
 0x1a3   : > { %539 = vperm.xlu1 %803, %v531_v28  }
 0x1f1   : > { %v400_v31 = vpop.permute.xlu0 %399  ;;  %v413_v32 = vpop.permute.xlu1 %412 }
 0x1f5   : > { %v478_v34 = vpop.permute.xlu0 %477  ;;  %v387_v35 = vpop.permute.xlu1 %386 }
 0x1f9   : > { %v426_v38 = vpop.permute.xlu1 %425  ;;  %v775_v39 = vpop.permute.xlu0 %774 }
 0x1fa   : > { %v777_v40 = vunpack.i.h.bf16 %v775_v39  ;;  %v776_v41 = vunpack.i.l.bf16 %v775_v39 }
 0x1fc   : > { %v393_v45 = vsel %vm392_vm3, %v387_v35, %v776_v41  ;;  %v394_v46 = vsel %vm392_vm3, %v776_v41, %v777_v40 }
 0x1fd   : > { %v780_v47 = vpop.permute.xlu0 %779  ;;  %v770_v48 = vpop.permute.xlu1 %769  ;;  %v398_v61 = vsel %vm971_vm6, %v394_v46, 0.0  ;;  %v397_v62 = vsel %vm979_vm9, %v393_v45, 0.0 }
 0x1fe   : > { %v782_v50 = vunpack.i.h.bf16 %v780_v47  ;;  %v781_v51 = vunpack.i.l.bf16 %v780_v47  ;;  %v772_v52 = vunpack.i.h.bf16 %v770_v48  ;;  %v771_v53 = vunpack.i.l.bf16 %v770_v48 }
 0x1ff   : > { %v468_v9 = vrot.slane %v398_v61, 4  ;;  %v467_v12 = vrot.slane %v397_v62, 4 }
 0x200   : > { %v420_v54 = vsel %vm418_vm8, %v771_v53, %v772_v52  ;;  %v433_v57 = vsel %vm431_vm4, %v781_v51, %v782_v50  ;;  %v419_v58 = vsel %vm418_vm8, %v413_v32, %v771_v53  ;;  %v432_v63 = vsel %vm431_vm4, %v426_v38, %v781_v51 }
 0x201   : > { %v785_v59 = vpop.permute.xlu0 %784  ;;  %v455_v60 = vpop.permute.xlu1 %454  ;;  %v424_v2 = vsel %vm971_vm6, %v420_v54, 0.0  ;;  %v437_v5 = vsel %vm967_vm5, %v433_v57, 0.0  ;;  %v423_v6 = vsel %vm979_vm9, %v419_v58, 0.0  ;;  %v436_v11 = vsel %vm975_vm7, %v432_v63, 0.0  ;;  %v528_v57 = vld [vmem:[%s1053_s3] sm:$0xff] }
 0x202   : > { %v787_v0 = vunpack.i.h.bf16 %v785_v59  ;;  %v786_v1 = vunpack.i.l.bf16 %v785_v59  ;;  %v491_v10 = vrot.slane %v424_v2, 6  ;;  %v497_v17 = vrot.slane %v437_v5, 4 }
 0x203   : > { %v490_v20 = vrot.slane %v423_v6, 6 }
 0x204   : > { %v406_v3 = vsel %vm405_vm10, %v400_v31, %v786_v1  ;;  %v407_v4 = vsel %vm405_vm10, %v786_v1, %v787_v0 }
 0x205   : > { %v790_v7 = vpop.permute.xlu0 %789  ;;  %v795_v8 = vpop.permute.xlu1 %794  ;;  %v411_v18 = vsel %vm967_vm5, %v407_v4, 0.0  ;;  %v410_v19 = vsel %vm975_vm7, %v406_v3, 0.0 }
 0x206   : > { %v792_v13 = vunpack.i.h.bf16 %v790_v7  ;;  %v791_v14 = vunpack.i.l.bf16 %v790_v7  ;;  %v797_v15 = vunpack.i.h.bf16 %v795_v8  ;;  %v796_v16 = vunpack.i.l.bf16 %v795_v8 }
 0x207   : > { %v474_v35 = vrot.slane %v411_v18, 2  ;;  %v473_v36 = vrot.slane %v410_v19, 2 }
 0x208   : > { %v484_v21 = vsel %vm483_vm11, %v478_v34, %v791_v14  ;;  %v485_v22 = vsel %vm483_vm11, %v791_v14, %v792_v13  ;;  %v461_v23 = vsel %vm460_vm12, %v455_v60, %v796_v16  ;;  %v462_v24 = vsel %vm460_vm12, %v796_v16, %v797_v15 }
 0x209   : > { %v504_v25 = vpop.permute.xlu0 %503  ;;  %v800_v26 = vpop.permute.xlu1 %799  ;;  %v516_v27 = vsel %vm514_vm14, %v379_v55, %v462_v24  ;;  %v523_v28 = vsel %vm514_vm14, %v485_v22, %v491_v10  ;;  %v522_v29 = vsel %vm514_vm14, %v484_v21, %v490_v20  ;;  %v515_v30 = vsel %vm514_vm14, %v378_v56, %v461_v23 }
 0x20a   : > { %v802_v31 = vunpack.i.h.bf16 %v800_v26  ;;  %v801_v32 = vunpack.i.l.bf16 %v800_v26  ;;  %v518_v33 = vsel %vm252_vm0, %v516_v27, %v468_v9  ;;  %v496_v34 = vrot.slane %v436_v11, 4 }
 0x20b   : > { %v517_v37 = vsel %vm252_vm0, %v515_v30, %v467_v12  ;;  %v525_v40 = vsel %vm252_vm0, %v523_v28, %v497_v17  ;;  %v521_v45 = vsel %vm519_vm15, %v518_v33, %v474_v35 }
 0x20c   : > { %v510_v38 = vsel %vm509_vm13, %v504_v25, %v801_v32  ;;  %v511_v39 = vsel %vm509_vm13, %v801_v32, %v802_v31  ;;  %v524_v41 = vsel %vm252_vm0, %v522_v29, %v496_v34  ;;  %v520_v47 = vsel %vm519_vm15, %v517_v37, %v473_v36 }
 0x20d   : > { %v443_v42 = vpop.permute.xlu0 %442  ;;  %v441_v44 = vpop.permute.xlu1 %440  ;;  %v527_v46 = vsel %vm519_vm15, %v525_v40, %v511_v39  ;;  %v526_v48 = vsel %vm519_vm15, %v524_v41, %v510_v38  ;;  %vm542_vm0 = vcmask 146432  }
 0x20e   : > { %v446_v50 = vsel %vm444_vm1, %v441_v44, %v443_v42  ;;  %v729_v51 = vpack.c.bf16 %v527_v46, %v521_v45  ;;  %v731_v52 = vpack.c.bf16 %v526_v48, %v520_v47 }
 0x20f   : > { %v450_v53 = vsel %vm971_vm6, %v446_v50, 0.0 }
 0x210   : > { %730 = vmatprep.subr.bf16.mxu0 %v729_v51  ;;  %733 = vmatprep.subr.bf16.mxu1 %v729_v51 }
 0x211   : > { %v439_v54 = vpop.permute.xlu1 %438  ;;  %732 = vmatpush1.bf16.msra.mxu0 %v731_v52  ;;  %735 = vmatpush1.bf16.msra.mxu1 %v731_v52 }
 0x212   : > { %v445_v55 = vsel %vm444_vm1, %v439_v54, %v441_v44  ;;  %721 = vmatprep.subr.msk.mxu0 %vm514_vm14, %v450_v53  ;;  %734 = vmatprep.subr.msk.mxu1 %vm514_vm14, %v450_v53 }
 0x213   : > { %v449_v56 = vsel %vm979_vm9, %v445_v55, 0.0 }
 0x215   : > { %722 = vmatpush1.msk.msra.mxu0 %vm514_vm14, %v449_v56  ;;  %736 = vmatpush1.msk.msra.mxu1 %vm514_vm14, %v449_v56 }
 0x216   : > { %723 = vmatmul.mubr.msk.f32.vlgmr.msra.gmra.mrb[2].mxu0 %vm542_vm0, %v528_v57  ;;  %724 = vmatmul.mubr.msk.f32.vlgmr.msra.gmra.mrb[0].mxu1 %vm542_vm0, %v529_v43 }
 0x21e   : > { %v535_v59 = vpop.permute.xlu0 %534 }
 0x222   : > { %v540_v58 = vpop.permute.xlu1 %539 }
 0x2e9   : > { %v621_v49 = vpop.f32.mrb[2].mxu0  ;;  %v627_v60 = vpop.f32.mrb[0].mxu1 }
 0x2ea   : > { %v622_v61 = vadd.f32 %v621_v49, %v535_v59  ;;  %v628_v62 = vadd.f32 %v627_v60, %v540_v58  ;;  %v623_v63 = vpop.f32.mrb[3].mxu0  ;;  %v629_v0 = vpop.f32.mrb[1].mxu1 }
 0x2eb   : > { %v624_v1 = vadd.f32 %v623_v63, %v535_v59  ;;  %v630_v2 = vadd.f32 %v629_v0, %v540_v58 }
 0x2ec   : > { %v632_v3 = vmax.f32 %v622_v61, 0.0  ;;  %v634_v4 = vmax.f32 %v628_v62, 0.0 }
 0x2ed   : > { %v633_v5 = vmax.f32 %v624_v1, 0.0  ;;  %v635_v6 = vmax.f32 %v630_v2, 0.0 }
 0x2ee   : > { %636 = vst [vmem:[%s237_s12] sm:$0xff] %v632_v3  ;;  %638 = vst [vmem:[%s237_s12 + $0x10] sm:$0x1f] %v634_v4 }
 0x2ef   : > { %637 = vst [vmem:[%s237_s12 + $0x8] sm:$0xff] %v633_v5  ;;  %639 = vst [vmem:[%s237_s12 + $0x18] sm:$0x1f] %v635_v6 }
 0x2f0 PF: > { %s16_s18 = sadd.s32 1, %s843_s18  }
 0x2f1   : > { %p13_p2 = scmp.ge.s32.totalorder %s16_s18, 4  }
 0x2f3   :  { %15 = sbr.rel (!%p13_p2) target bundleno = 1 (0x1), region = 75 }
 0x2fa   :  { %661 = vsyncpa [#allocation3], 1 }
 0x2fb   :  { %663 = vsyncpa [#allocation3 + $0x1], 1 }

</bundles_post_ra>
